<compile_context>
chip_gen: v6e
topology: v6e:2x2x1
jax: 0.10.0
libtpu: 0.0.40
codegen_flags: <defaults>
</compile_context>

<pallas_src>
import functools

import jax
import jax.numpy as jnp
from jax.experimental import pallas as pl
from jax.experimental.pallas import tpu as pltpu


# ----------------------------------------------------------------------------
# Fused Pallas kernel: the entire forecast recurrence (one grid step = one GRU step)
# ----------------------------------------------------------------------------
def _decoder_recurrence_kernel(gi_r_ref, gi_z_ref, gi_n_ref, h0_ref,
                               w_hh_r_ref, w_hh_z_ref, w_hh_n_ref, b_hh_n_ref,
                               w_fold_r_ref, w_fold_z_ref, w_fold_n_ref,
                               h_out_ref, h_scr):
    """Per grid step t:
         gi_*  : precomputed input-projection term for step t (N, H) per gate
         h_scr : VMEM-resident hidden state (N, H), persists across steps
         h_out : hidden state after this step (consumed by fc_out outside)
    """
    t = pl.program_id(0)

    @pl.when(t == 0)
    def _():
        h_scr[...] = h0_ref[...]

    h = h_scr[...]

    # fc_out feedback folded into the input projection:
    #   x_prev[t>=1] * w_ih[0,:]  ==  h @ (w_out @ w_ih[0:1,:]) + b_out*w_ih[0,:]
    # (the constant part and step-0's xn term are pre-added into gi_* outside).
    fb = jnp.where(t > 0, 1.0, 0.0)

    i_r = gi_r_ref[...] + fb * jnp.dot(h, w_fold_r_ref[...],
                                       preferred_element_type=jnp.float32)
    i_z = gi_z_ref[...] + fb * jnp.dot(h, w_fold_z_ref[...],
                                       preferred_element_type=jnp.float32)
    i_n = gi_n_ref[...] + fb * jnp.dot(h, w_fold_n_ref[...],
                                       preferred_element_type=jnp.float32)

    h_r = jnp.dot(h, w_hh_r_ref[...], preferred_element_type=jnp.float32)
    h_z = jnp.dot(h, w_hh_z_ref[...], preferred_element_type=jnp.float32)
    h_n = jnp.dot(h, w_hh_n_ref[...], preferred_element_type=jnp.float32) + b_hh_n_ref[...]

    # standard GRU gates (r, z, n); b_ih and b_hh for r/z are pre-folded into gi_*,
    # b_hh_n must stay inside r*(...) so it is added here.
    r = jax.nn.sigmoid(i_r + h_r)
    z = jax.nn.sigmoid(i_z + h_z)
    n = jnp.tanh(i_n + r * h_n)
    h_new = (1.0 - z) * n + z * h

    h_scr[...] = h_new
    h_out_ref[...] = h_new


# ----------------------------------------------------------------------------
# Decoder forward: JAX glue (embedding gather, batched pre/post projections)
# + one fused Pallas call for the recurrence.
# ----------------------------------------------------------------------------
@functools.partial(jax.jit, static_argnames=("forecast_len",))
def decoder_forward(X, hn, xn, params, forecast_len):
    """
    X  : [batch, hist_len + forecast_len, city, num_features] (last feature = emb index)
    hn : [batch, city, hid_dim]
    xn : [batch, city, 1]
    returns preds: [batch, forecast_len, city, 1]
    """
    B, _, C, _ = X.shape
    hid = hn.shape[-1]
    N = B * C
    T = forecast_len

    emb_table = params["emb_table"]          # (V, E)
    w_ih = params["w_ih"]                    # (E + 1, 3H)
    w_hh = params["w_hh"]                    # (H, 3H)
    b_ih = params["b_ih"]                    # (1, 3H)
    b_hh = params["b_hh"]                    # (1, 3H)
    w_out = params["w_out"]                  # (H, 1)
    b_out = params["b_out"]                  # (1, 1)

    # ---- hoisted, batched precompute (one big matmul for all steps) --------
    idx = X[:, :T, :, -1].astype(jnp.int32)                       # [B, T, C]
    emb = jnp.take(emb_table, idx, axis=0)                        # [B, T, C, E]
    emb = jnp.transpose(emb, (1, 0, 2, 3)).reshape(T * N, -1)     # [T*N, E]

    # b_ih (all gates) + b_hh (r, z gates only) folded into the hoisted term.
    b_fold = b_ih + jnp.concatenate(
        [b_hh[:, :2 * hid], jnp.zeros((1, hid), b_hh.dtype)], axis=-1)
    gi_pre = (emb @ w_ih[1:, :] + b_fold).reshape(T, N, 3 * hid)  # [T, N, 3H]

    # fc_out bias feedback for steps >= 1, and the given xn for step 0.
    gi_pre = gi_pre.at[1:].add(b_out[0, 0] * w_ih[0:1, :])
    gi_pre = gi_pre.at[0].add(xn.reshape(N, 1) * w_ih[0:1, :])

    # fc_out weight folded into the input projection.
    w_fold = w_out @ w_ih[0:1, :]                                 # (H, 3H)

    # split per gate so the kernel never slices lanes at offsets 32 / 64.
    gi_r, gi_z, gi_n = (gi_pre[..., :hid],
                        gi_pre[..., hid:2 * hid],
                        gi_pre[..., 2 * hid:])
    w_hh_r, w_hh_z, w_hh_n = (w_hh[:, :hid], w_hh[:, hid:2 * hid], w_hh[:, 2 * hid:])
    w_fd_r, w_fd_z, w_fd_n = (w_fold[:, :hid], w_fold[:, hid:2 * hid], w_fold[:, 2 * hid:])
    b_hh_n = b_hh[:, 2 * hid:]                                    # (1, H)

    h0 = hn.reshape(N, hid)

    step3 = lambda t: (t, 0, 0)        # per-step blocks
    res2 = lambda t: (0, 0)            # weights: resident in VMEM across all steps

    h_all = pl.pallas_call(
        _decoder_recurrence_kernel,
        out_shape=jax.ShapeDtypeStruct((T, N, hid), jnp.float32),
        grid_spec=pltpu.PrefetchScalarGridSpec(
            num_scalar_prefetch=0,
            grid=(T,),
            in_specs=[
                pl.BlockSpec((None, N, hid), step3),   # gi_r
                pl.BlockSpec((None, N, hid), step3),   # gi_z
                pl.BlockSpec((None, N, hid), step3),   # gi_n
                pl.BlockSpec((N, hid), res2),          # h0
                pl.BlockSpec((hid, hid), res2),        # w_hh_r
                pl.BlockSpec((hid, hid), res2),        # w_hh_z
                pl.BlockSpec((hid, hid), res2),        # w_hh_n
                pl.BlockSpec((1, hid), res2),          # b_hh_n
                pl.BlockSpec((hid, hid), res2),        # w_fold_r
                pl.BlockSpec((hid, hid), res2),        # w_fold_z
                pl.BlockSpec((hid, hid), res2),        # w_fold_n
            ],
            out_specs=pl.BlockSpec((None, N, hid), step3),
            scratch_shapes=[pltpu.VMEM((N, hid), jnp.float32)],
        ),
        compiler_params=pltpu.CompilerParams(
            dimension_semantics=("arbitrary",)),       # serial recurrence
    )(gi_r, gi_z, gi_n, h0,
      w_hh_r, w_hh_z, w_hh_n, b_hh_n,
      w_fd_r, w_fd_z, w_fd_n)

    # fc_out for every step in one batched matmul (outside the recurrence).
    preds = h_all.reshape(T * N, hid) @ w_out + b_out             # [T*N, 1]
    preds = preds.reshape(T, B, C, 1).transpose(1, 0, 2, 3)       # [B, T, C, 1]
    return preds


# ----------------------------------------------------------------------------
# Pure-JAX reference (direct, unfused translation of the PyTorch module)
# ----------------------------------------------------------------------------
def decoder_forward_ref(X, hn, xn, params, forecast_len):
    B, _, C, _ = X.shape
    hid = hn.shape[-1]
    h = hn.reshape(B * C, hid)
    x_prev = xn.reshape(B * C, 1)
    preds = []
    for i in range(forecast_len):
        idx = X[:, i, :, -1].astype(jnp.int32)
        emb = jnp.take(params["emb_table"], idx, axis=0).reshape(B * C, -1)
        x_cat = jnp.concatenate([x_prev, emb], axis=-1)
        gi = x_cat @ params["w_ih"] + params["b_ih"]
        gh = h @ params["w_hh"] + params["b_hh"]
        i_r, i_z, i_n = gi[:, :hid], gi[:, hid:2 * hid], gi[:, 2 * hid:]
        h_r, h_z, h_n = gh[:, :hid], gh[:, hid:2 * hid], gh[:, 2 * hid:]
        r = jax.nn.sigmoid(i_r + h_r)
        z = jax.nn.sigmoid(i_z + h_z)
        n = jnp.tanh(i_n + r * h_n)
        h = (1.0 - z) * n + z * h
        pred = h @ params["w_out"] + params["b_out"]
        x_prev = pred
        preds.append(pred.reshape(B, C, 1))
    return jnp.stack(preds, axis=1)


# ----------------------------------------------------------------------------
# Main
# ----------------------------------------------------------------------------
if __name__ == "__main__":
    # module hyperparameters (small, consistent with the forward pass)
    in_dim = 4
    emb_dim = 8
    hid_dim = 32
    city_num = 16
    num_embeddings = 10
    hist_len = 8
    forecast_len = 4
    batch_size = 2

    key = jax.random.PRNGKey(0)
    keys = jax.random.split(key, 12)

    params = {
        "emb_table": 0.1 * jax.random.normal(keys[0], (num_embeddings, emb_dim), jnp.float32),
        # GRUCell(emb_dim + 1, hid_dim): weights stored already transposed to (in, 3H)
        "w_ih": 0.1 * jax.random.normal(keys[1], (emb_dim + 1, 3 * hid_dim), jnp.float32),
        "w_hh": 0.1 * jax.random.normal(keys[2], (hid_dim, 3 * hid_dim), jnp.float32),
        "b_ih": 0.1 * jax.random.normal(keys[3], (1, 3 * hid_dim), jnp.float32),
        "b_hh": 0.1 * jax.random.normal(keys[4], (1, 3 * hid_dim), jnp.float32),
        # fc_out: Linear(hid_dim, 1), stored as (hid, 1)
        "w_out": 0.1 * jax.random.normal(keys[5], (hid_dim, 1), jnp.float32),
        "b_out": 0.1 * jax.random.normal(keys[6], (1, 1), jnp.float32),
    }

    X = jax.random.normal(
        keys[7], (batch_size, hist_len + forecast_len, city_num, in_dim), jnp.float32)
    # last feature column carries integer embedding indices (stored as float, as in PyTorch)
    idx_feat = jax.random.randint(
        keys[8], (batch_size, hist_len + forecast_len, city_num), 0, num_embeddings)
    X = X.at[..., -1].set(idx_feat.astype(jnp.float32))

    hn = jax.random.normal(keys[9], (batch_size, city_num, hid_dim), jnp.float32)
    xn = jax.random.normal(keys[10], (batch_size, city_num, 1), jnp.float32)

    preds = decoder_forward(X, hn, xn, params, forecast_len)
    preds = jax.block_until_ready(preds)

    preds_ref = decoder_forward_ref(X, hn, xn, params, forecast_len)
    assert preds.shape == (batch_size, forecast_len, city_num, 1)
    assert jnp.allclose(preds, preds_ref, atol=1e-4, rtol=1e-4), (
        float(jnp.max(jnp.abs(preds - preds_ref))))

    print("KERNEL_OK")
</pallas_src>

<mosaic_0001>
module attributes {stable_mosaic.version = 11 : i64} {
  func.func @_decoder_recurrence_kernel(%arg0: i32, %arg1: memref<1x32x32xf32, #tpu.memory_space<vmem>>, %arg2: memref<1x32x32xf32, #tpu.memory_space<vmem>>, %arg3: memref<1x32x32xf32, #tpu.memory_space<vmem>>, %arg4: memref<32x32xf32, #tpu.memory_space<vmem>>, %arg5: memref<32x32xf32, #tpu.memory_space<vmem>>, %arg6: memref<32x32xf32, #tpu.memory_space<vmem>>, %arg7: memref<32x32xf32, #tpu.memory_space<vmem>>, %arg8: memref<1x32xf32, #tpu.memory_space<vmem>>, %arg9: memref<32x32xf32, #tpu.memory_space<vmem>>, %arg10: memref<32x32xf32, #tpu.memory_space<vmem>>, %arg11: memref<32x32xf32, #tpu.memory_space<vmem>>, %arg12: memref<1x32x32xf32, #tpu.memory_space<vmem>>, %arg13: memref<32x32xf32, #tpu.memory_space<vmem>>) attributes {dimension_semantics = [#tpu.dimension_semantics<arbitrary>], iteration_bounds = array<i64: 4>, scalar_prefetch = 0 : i64, scratch_operands = 1 : i64, tpu.core_type = #tpu.core_type<tc>, window_params = [{transform_indices = @transform_0, window_bounds = array<i64: 1, 32, 32>}, {transform_indices = @transform_1, window_bounds = array<i64: 1, 32, 32>}, {transform_indices = @transform_2, window_bounds = array<i64: 1, 32, 32>}, {pipeline_mode = #tpu.pipeline_mode<synchronous>, transform_indices = @transform_3, window_bounds = array<i64: 32, 32>}, {pipeline_mode = #tpu.pipeline_mode<synchronous>, transform_indices = @transform_4, window_bounds = array<i64: 32, 32>}, {pipeline_mode = #tpu.pipeline_mode<synchronous>, transform_indices = @transform_5, window_bounds = array<i64: 32, 32>}, {pipeline_mode = #tpu.pipeline_mode<synchronous>, transform_indices = @transform_6, window_bounds = array<i64: 32, 32>}, {pipeline_mode = #tpu.pipeline_mode<synchronous>, transform_indices = @transform_7, window_bounds = array<i64: 1, 32>}, {pipeline_mode = #tpu.pipeline_mode<synchronous>, transform_indices = @transform_8, window_bounds = array<i64: 32, 32>}, {pipeline_mode = #tpu.pipeline_mode<synchronous>, transform_indices = @transform_9, window_bounds = array<i64: 32, 32>}, {pipeline_mode = #tpu.pipeline_mode<synchronous>, transform_indices = @transform_10, window_bounds = array<i64: 32, 32>}, {transform_indices = @transform_11, window_bounds = array<i64: 1, 32, 32>}]} {
    %c0_i32 = arith.constant 0 : i32
    %0 = arith.cmpi eq, %arg0, %c0_i32 : i32
    %1 = arith.extui %0 : i1 to i32
    %c0_i32_0 = arith.constant 0 : i32
    %2 = arith.cmpi ne, %1, %c0_i32_0 : i32
    scf.if %2 {
      %c0_41 = arith.constant 0 : index
      %c0_42 = arith.constant 0 : index
      %60 = vector.load %arg4[%c0_41, %c0_42] : memref<32x32xf32, #tpu.memory_space<vmem>>, vector<32x32xf32>
      %c0_43 = arith.constant 0 : index
      %c0_44 = arith.constant 0 : index
      %61 = vector.load %arg13[%c0_43, %c0_44] : memref<32x32xf32, #tpu.memory_space<vmem>>, vector<32x32xf32>
      tpu.vector_store %arg13[%c0_43, %c0_44], %60 {strides = array<i32>} : memref<32x32xf32, #tpu.memory_space<vmem>>, vector<32x32xf32>,
    } else {
    }
    %c0 = arith.constant 0 : index
    %c0_1 = arith.constant 0 : index
    %3 = vector.load %arg13[%c0, %c0_1] : memref<32x32xf32, #tpu.memory_space<vmem>>, vector<32x32xf32>
    %c0_i32_2 = arith.constant 0 : i32
    %4 = arith.cmpi sgt, %arg0, %c0_i32_2 : i32
    %cst = arith.constant 1.000000e+00 : f32
    %cst_3 = arith.constant 0.000000e+00 : f32
    %5 = arith.select %4, %cst, %cst_3 : f32
    %c0_4 = arith.constant 0 : index
    %c0_5 = arith.constant 0 : index
    %c0_6 = arith.constant 0 : index
    %6 = vector.load %arg1[%c0_4, %c0_5, %c0_6] : memref<1x32x32xf32, #tpu.memory_space<vmem>>, vector<1x32x32xf32>
    %7 = vector.shape_cast %6 : vector<1x32x32xf32> to vector<32x32xf32>
    %c0_7 = arith.constant 0 : index
    %c0_8 = arith.constant 0 : index
    %8 = vector.load %arg9[%c0_7, %c0_8] : memref<32x32xf32, #tpu.memory_space<vmem>>, vector<32x32xf32>
    %cst_9 = arith.constant dense<0.000000e+00> : vector<32x32xf32>
    %9 = tpu.matmul %3, %8, %cst_9 {dimension_numbers = #tpu.dot_dimension_numbers<[1], [0], [0], [1], [0, 0, 1, 1], [], []>} : vector<32x32xf32>, vector<32x32xf32>, vector<32x32xf32> -> vector<32x32xf32>
    %10 = vector.broadcast %5 : f32 to vector<32x32xf32>
    %11 = arith.mulf %10, %9 : vector<32x32xf32>
    %12 = arith.addf %7, %11 : vector<32x32xf32>
    %c0_10 = arith.constant 0 : index
    %c0_11 = arith.constant 0 : index
    %c0_12 = arith.constant 0 : index
    %13 = vector.load %arg2[%c0_10, %c0_11, %c0_12] : memref<1x32x32xf32, #tpu.memory_space<vmem>>, vector<1x32x32xf32>
    %14 = vector.shape_cast %13 : vector<1x32x32xf32> to vector<32x32xf32>
    %c0_13 = arith.constant 0 : index
    %c0_14 = arith.constant 0 : index
    %15 = vector.load %arg10[%c0_13, %c0_14] : memref<32x32xf32, #tpu.memory_space<vmem>>, vector<32x32xf32>
    %cst_15 = arith.constant dense<0.000000e+00> : vector<32x32xf32>
    %16 = tpu.matmul %3, %15, %cst_15 {dimension_numbers = #tpu.dot_dimension_numbers<[1], [0], [0], [1], [0, 0, 1, 1], [], []>} : vector<32x32xf32>, vector<32x32xf32>, vector<32x32xf32> -> vector<32x32xf32>
    %17 = vector.broadcast %5 : f32 to vector<32x32xf32>
    %18 = arith.mulf %17, %16 : vector<32x32xf32>
    %19 = arith.addf %14, %18 : vector<32x32xf32>
    %c0_16 = arith.constant 0 : index
    %c0_17 = arith.constant 0 : index
    %c0_18 = arith.constant 0 : index
    %20 = vector.load %arg3[%c0_16, %c0_17, %c0_18] : memref<1x32x32xf32, #tpu.memory_space<vmem>>, vector<1x32x32xf32>
    %21 = vector.shape_cast %20 : vector<1x32x32xf32> to vector<32x32xf32>
    %c0_19 = arith.constant 0 : index
    %c0_20 = arith.constant 0 : index
    %22 = vector.load %arg11[%c0_19, %c0_20] : memref<32x32xf32, #tpu.memory_space<vmem>>, vector<32x32xf32>
    %cst_21 = arith.constant dense<0.000000e+00> : vector<32x32xf32>
    %23 = tpu.matmul %3, %22, %cst_21 {dimension_numbers = #tpu.dot_dimension_numbers<[1], [0], [0], [1], [0, 0, 1, 1], [], []>} : vector<32x32xf32>, vector<32x32xf32>, vector<32x32xf32> -> vector<32x32xf32>
    %24 = vector.broadcast %5 : f32 to vector<32x32xf32>
    %25 = arith.mulf %24, %23 : vector<32x32xf32>
    %26 = arith.addf %21, %25 : vector<32x32xf32>
    %c0_22 = arith.constant 0 : index
    %c0_23 = arith.constant 0 : index
    %27 = vector.load %arg5[%c0_22, %c0_23] : memref<32x32xf32, #tpu.memory_space<vmem>>, vector<32x32xf32>
    %cst_24 = arith.constant dense<0.000000e+00> : vector<32x32xf32>
    %28 = tpu.matmul %3, %27, %cst_24 {dimension_numbers = #tpu.dot_dimension_numbers<[1], [0], [0], [1], [0, 0, 1, 1], [], []>} : vector<32x32xf32>, vector<32x32xf32>, vector<32x32xf32> -> vector<32x32xf32>
    %c0_25 = arith.constant 0 : index
    %c0_26 = arith.constant 0 : index
    %29 = vector.load %arg6[%c0_25, %c0_26] : memref<32x32xf32, #tpu.memory_space<vmem>>, vector<32x32xf32>
    %cst_27 = arith.constant dense<0.000000e+00> : vector<32x32xf32>
    %30 = tpu.matmul %3, %29, %cst_27 {dimension_numbers = #tpu.dot_dimension_numbers<[1], [0], [0], [1], [0, 0, 1, 1], [], []>} : vector<32x32xf32>, vector<32x32xf32>, vector<32x32xf32> -> vector<32x32xf32>
    %c0_28 = arith.constant 0 : index
    %c0_29 = arith.constant 0 : index
    %31 = vector.load %arg7[%c0_28, %c0_29] : memref<32x32xf32, #tpu.memory_space<vmem>>, vector<32x32xf32>
    %cst_30 = arith.constant dense<0.000000e+00> : vector<32x32xf32>
    %32 = tpu.matmul %3, %31, %cst_30 {dimension_numbers = #tpu.dot_dimension_numbers<[1], [0], [0], [1], [0, 0, 1, 1], [], []>} : vector<32x32xf32>, vector<32x32xf32>, vector<32x32xf32> -> vector<32x32xf32>
    %c0_31 = arith.constant 0 : index
    %c0_32 = arith.constant 0 : index
    %33 = vector.load %arg8[%c0_31, %c0_32] : memref<1x32xf32, #tpu.memory_space<vmem>>, vector<1x32xf32>
    %34 = vector.broadcast %33 : vector<1x32xf32> to vector<32x32xf32>
    %35 = arith.addf %32, %34 : vector<32x32xf32>
    %36 = arith.addf %12, %28 : vector<32x32xf32>
    %37 = arith.negf %36 : vector<32x32xf32>
    %38 = math.exp %37 : vector<32x32xf32>
    %cst_33 = arith.constant 1.000000e+00 : f32
    %39 = vector.broadcast %cst_33 : f32 to vector<32x32xf32>
    %40 = arith.addf %39, %38 : vector<32x32xf32>
    %41 = arith.divf %39, %40 : vector<32x32xf32>
    %42 = arith.addf %19, %30 : vector<32x32xf32>
    %43 = arith.negf %42 : vector<32x32xf32>
    %44 = math.exp %43 : vector<32x32xf32>
    %cst_34 = arith.constant 1.000000e+00 : f32
    %45 = vector.broadcast %cst_34 : f32 to vector<32x32xf32>
    %46 = arith.addf %45, %44 : vector<32x32xf32>
    %47 = arith.divf %45, %46 : vector<32x32xf32>
    %48 = arith.mulf %41, %35 : vector<32x32xf32>
    %49 = arith.addf %26, %48 : vector<32x32xf32>
    %50 = math.tanh %49 : vector<32x32xf32>
    %cst_35 = arith.constant 1.000000e+00 : f32
    %51 = vector.broadcast %cst_35 : f32 to vector<32x32xf32>
    %52 = arith.subf %51, %47 : vector<32x32xf32>
    %53 = arith.mulf %52, %50 : vector<32x32xf32>
    %54 = arith.mulf %47, %3 : vector<32x32xf32>
    %55 = arith.addf %53, %54 : vector<32x32xf32>
    %c0_36 = arith.constant 0 : index
    %c0_37 = arith.constant 0 : index
    %56 = vector.load %arg13[%c0_36, %c0_37] : memref<32x32xf32, #tpu.memory_space<vmem>>, vector<32x32xf32>
    tpu.vector_store %arg13[%c0_36, %c0_37], %55 {strides = array<i32>} : memref<32x32xf32, #tpu.memory_space<vmem>>, vector<32x32xf32>,
    %c0_38 = arith.constant 0 : index
    %c0_39 = arith.constant 0 : index
    %c0_40 = arith.constant 0 : index
    %57 = vector.load %arg12[%c0_38, %c0_39, %c0_40] : memref<1x32x32xf32, #tpu.memory_space<vmem>>, vector<1x32x32xf32>
    %58 = vector.shape_cast %57 : vector<1x32x32xf32> to vector<32x32xf32>
    %59 = vector.shape_cast %55 : vector<32x32xf32> to vector<1x32x32xf32>
    tpu.vector_store %arg12[%c0_38, %c0_39, %c0_40], %59 {strides = array<i32>} : memref<1x32x32xf32, #tpu.memory_space<vmem>>, vector<1x32x32xf32>,
    return
  }
  func.func @transform_0(%arg0: i32) -> (i32, i32, i32) {
    %c0_i32 = arith.constant 0 : i32
    %c0_i32_0 = arith.constant 0 : i32
    %c0_i32_1 = arith.constant 0 : i32
    return %arg0, %c0_i32, %c0_i32_0 : i32, i32, i32
  }
  func.func @transform_1(%arg0: i32) -> (i32, i32, i32) {
    %c0_i32 = arith.constant 0 : i32
    %c0_i32_0 = arith.constant 0 : i32
    %c0_i32_1 = arith.constant 0 : i32
    return %arg0, %c0_i32, %c0_i32_0 : i32, i32, i32
  }
  func.func @transform_2(%arg0: i32) -> (i32, i32, i32) {
    %c0_i32 = arith.constant 0 : i32
    %c0_i32_0 = arith.constant 0 : i32
    %c0_i32_1 = arith.constant 0 : i32
    return %arg0, %c0_i32, %c0_i32_0 : i32, i32, i32
  }
  func.func @transform_3(%arg0: i32) -> (i32, i32) {
    %c0_i32 = arith.constant 0 : i32
    %c0_i32_0 = arith.constant 0 : i32
    %c0_i32_1 = arith.constant 0 : i32
    return %c0_i32, %c0_i32_0 : i32, i32
  }
  func.func @transform_4(%arg0: i32) -> (i32, i32) {
    %c0_i32 = arith.constant 0 : i32
    %c0_i32_0 = arith.constant 0 : i32
    %c0_i32_1 = arith.constant 0 : i32
    return %c0_i32, %c0_i32_0 : i32, i32
  }
  func.func @transform_5(%arg0: i32) -> (i32, i32) {
    %c0_i32 = arith.constant 0 : i32
    %c0_i32_0 = arith.constant 0 : i32
    %c0_i32_1 = arith.constant 0 : i32
    return %c0_i32, %c0_i32_0 : i32, i32
  }
  func.func @transform_6(%arg0: i32) -> (i32, i32) {
    %c0_i32 = arith.constant 0 : i32
    %c0_i32_0 = arith.constant 0 : i32
    %c0_i32_1 = arith.constant 0 : i32
    return %c0_i32, %c0_i32_0 : i32, i32
  }
  func.func @transform_7(%arg0: i32) -> (i32, i32) {
    %c0_i32 = arith.constant 0 : i32
    %c0_i32_0 = arith.constant 0 : i32
    %c0_i32_1 = arith.constant 0 : i32
    return %c0_i32, %c0_i32_0 : i32, i32
  }
  func.func @transform_8(%arg0: i32) -> (i32, i32) {
    %c0_i32 = arith.constant 0 : i32
    %c0_i32_0 = arith.constant 0 : i32
    %c0_i32_1 = arith.constant 0 : i32
    return %c0_i32, %c0_i32_0 : i32, i32
  }
  func.func @transform_9(%arg0: i32) -> (i32, i32) {
    %c0_i32 = arith.constant 0 : i32
    %c0_i32_0 = arith.constant 0 : i32
    %c0_i32_1 = arith.constant 0 : i32
    return %c0_i32, %c0_i32_0 : i32, i32
  }
  func.func @transform_10(%arg0: i32) -> (i32, i32) {
    %c0_i32 = arith.constant 0 : i32
    %c0_i32_0 = arith.constant 0 : i32
    %c0_i32_1 = arith.constant 0 : i32
    return %c0_i32, %c0_i32_0 : i32, i32
  }
  func.func @transform_11(%arg0: i32) -> (i32, i32, i32) {
    %c0_i32 = arith.constant 0 : i32
    %c0_i32_0 = arith.constant 0 : i32
    %c0_i32_1 = arith.constant 0 : i32
    return %arg0, %c0_i32, %c0_i32_0 : i32, i32, i32
  }
}

</mosaic_0001>

<bundles_post_ra>
// kernel: decoder_forward.1
= control target key start
LH: loop header
LB: loop body
LE: loop exit
PB: predicated region body
PF: predicated region fallthrough
CT: control target
= control target key end

     0   :  { %s1509_s17 = smov 0   ;;  %s1743_s0 = inlined_call_operand.vmem [shape: f32[4,32,32], index: 0, kind: input, shape index: {}]   ;;  %s1744_s1 = inlined_call_operand.vmem [shape: f32[4,32,32], index: 1, kind: input, shape index: {}]   ;;  %s1745_s2 = inlined_call_operand.vmem [shape: f32[4,32,32], index: 2, kind: input, shape index: {}]   ;;  %s1746_s3 = inlined_call_operand.vmem [shape: f32[32,32], index: 3, kind: input, shape index: {}]   ;;  %s1747_s4 = inlined_call_operand.vmem [shape: f32[32,32], index: 4, kind: input, shape index: {}]   ;;  %s1748_s5 = inlined_call_operand.vmem [shape: f32[32,32], index: 5, kind: input, shape index: {}]   ;;  %s1749_s6 = inlined_call_operand.vmem [shape: f32[32,32], index: 6, kind: input, shape index: {}]   ;;  %s1750_s7 = inlined_call_operand.vmem [shape: f32[1,32], index: 7, kind: input, shape index: {}]   ;;  %s1751_s8 = inlined_call_operand.vmem [shape: f32[32,32], index: 8, kind: input, shape index: {}]   ;;  %s1752_s9 = inlined_call_operand.vmem [shape: f32[32,32], index: 9, kind: input, shape index: {}]   ;;  %s1753_s10 = inlined_call_operand.vmem [shape: f32[32,32], index: 10, kind: input, shape index: {}]   ;;  %s1754_s11 = inlined_call_operand.vmem [shape: f32[4,32,32], index: 11, kind: output, shape index: {}]  }
   0x1 LB: > { %s1515_s18 = sadd.s32 4294967295, %s1447_s17   ;;  %p1212_p0 = scmp.ge.s32.totalorder %s1447_s17, 1  ;;  %s1447_s17 = sphi %s1509_s17, %s21_s17  }
   0x2   : > { %p357_p1 = scmp.lt.s32.totalorder %s1447_s17, 5 }
   0x4   : > { %p358_p2 = pnand %p1212_p0, %p357_p1 }
   0x5   : > { %p407_p3 = scmp.lt.s32.totalorder (!%p358_p2), %s1515_s18, 3  ;;  %p1221_p4 = scmp.ne.s32.totalorder (!%p358_p2), %s1515_s18, 0 }
   0x6   : > { %361 = sbr.rel (%p358_p2) target bundleno = 299 (0x12b), region = 64 }
   0xb   : > { %s408_s19 = scalar_select %p407_p3, %s1515_s18, 3 }
   0xc   : > { %430 = sbr.rel (%p1221_p4) target bundleno = 20 (0x14), region = 68 }
   0xd   : > { %s1257_s20 = sshll.u32 %s408_s19, 5 }
   0xe   : > { %s1524_s23 = scalar_lea.vmem %s1743_s0, %s1257_s20  ;;  %s1529_s26 = scalar_lea.vmem %s1744_s1, %s1257_s20 }
   0xf   : > { %s1534_s29 = scalar_lea.vmem %s1745_s2, %s1257_s20  ;;  %s1539_s13 = scalar_lea.vmem %s1754_s11, %s1257_s20 }
  0x11   : > { %v431_v0 = vld [vmem:[%s1746_s3] sm:$0xff]  ;;  %vm435_vm0 = vcmask 261120   ;;  %v432_v1 = vld [vmem:[%s1746_s3 + $0x8] sm:$0xff]  ;;  %v433_v2 = vld [vmem:[%s1746_s3 + $0x10] sm:$0xff] }
  0x12   : > { %436 = vst.msk [vmem:[#allocation2] sm:$0xff] %vm435_vm0, %v431_v0  ;;  %437 = vst.msk [vmem:[#allocation2 + $0x8] sm:$0xff] %vm435_vm0, %v432_v1  ;;  %v434_v3 = vld [vmem:[%s1746_s3 + $0x18] sm:$0xff] }
  0x13   : > { %438 = vst.msk [vmem:[#allocation2 + $0x10] sm:$0xff] %vm435_vm0, %v433_v2  ;;  %439 = vst.msk [vmem:[#allocation2 + $0x18] sm:$0xff] %vm435_vm0, %v434_v3 }
  0x14 PF: > { %v453_v4 = vld [vmem:[%s1751_s8 + $0x18] sm:$0xff]  ;;  %v452_v6 = vld [vmem:[%s1751_s8 + $0x10] sm:$0xff]  ;;  %v451_v8 = vld [vmem:[%s1751_s8 + $0x8] sm:$0xff]  ;;  %vm454_vm1 = vcmask 261120   ;;  %p444_p5 = scmp.gt.s32.totalorder %s1515_s18, 0 }
  0x15   : > { %v568_v5 = vld [vmem:[%s1752_s9 + $0x18] sm:$0xff]  ;;  %1309 = vmatprep.subr.mxu0 %v453_v4  ;;  %v567_v7 = vld [vmem:[%s1752_s9 + $0x10] sm:$0xff]  ;;  %v566_v9 = vld [vmem:[%s1752_s9 + $0x8] sm:$0xff] }
  0x16   : > { %1323 = vmatprep.subr.mxu1 %v568_v5  ;;  %1310 = vmatpush3.msra.mxu0 %v453_v4  ;;  %v450_v10 = vld [vmem:[%s1751_s8] sm:$0xff]  ;;  %v669_v14 = vld [vmem:[%s1753_s10 + $0x18] sm:$0xff]  ;;  %v668_v16 = vld [vmem:[%s1753_s10 + $0x10] sm:$0xff]  ;;  %s445_s21 = scalar_select %p444_p5, 1.0, 0.0 }
  0x17   : > { %1324 = vmatpush3.msra.mxu1 %v568_v5  ;;  %1311 = vmatprep.subr.mxu0 %v452_v6  ;;  %v565_v11 = vld [vmem:[%s1752_s9] sm:$0xff]  ;;  %v766_v15 = vld [vmem:[%s1747_s4 + $0x18] sm:$0xff]  ;;  %v765_v17 = vld [vmem:[%s1747_s4 + $0x10] sm:$0xff] }
  0x18   : > { %1325 = vmatprep.subr.mxu1 %v567_v7  ;;  %1312 = vmatpush3.msra.mxu0 %v452_v6  ;;  %v667_v20 = vld [vmem:[%s1753_s10 + $0x8] sm:$0xff]  ;;  %v666_v22 = vld [vmem:[%s1753_s10] sm:$0xff]  ;;  %v855_v24 = vld [vmem:[%s1748_s5 + $0x18] sm:$0xff]  ;;  %v1683_v36 = vstv %s445_s21 }
  0x19   : > { %1326 = vmatpush3.msra.mxu1 %v567_v7  ;;  %1313 = vmatprep.subr.mxu0 %v451_v8  ;;  %v1578_v12 = vld [vmem:[#allocation2] sm:$0xff]  ;;  %v1580_v13 = vld [vmem:[#allocation2 + $0x8] sm:$0xff]  ;;  %v854_v25 = vld [vmem:[%s1748_s5 + $0x10] sm:$0xff] }
  0x1a   : > { %1327 = vmatprep.subr.mxu1 %v566_v9  ;;  %1314 = vmatpush3.msra.mxu0 %v451_v8  ;;  %v1602_v18 = vld [vmem:[#allocation2 + $0x10] sm:$0xff]  ;;  %v1604_v19 = vld [vmem:[#allocation2 + $0x18] sm:$0xff]  ;;  %v764_v21 = vld [vmem:[%s1747_s4 + $0x8] sm:$0xff] }
  0x1b   : > { %1328 = vmatpush3.msra.mxu1 %v566_v9  ;;  %1315 = vmatprep.subr.mxu0 %v450_v10  ;;  %v763_v23 = vld [vmem:[%s1747_s4] sm:$0xff]  ;;  %v944_v26 = vld [vmem:[%s1749_s6 + $0x18] sm:$0xff]  ;;  %v853_v27 = vld [vmem:[%s1748_s5 + $0x8] sm:$0xff] }
  0x1c   : > { %1329 = vmatprep.subr.mxu1 %v565_v11  ;;  %1316 = vmatpush3.msra.mxu0 %v450_v10  ;;  %v852_v28 = vld [vmem:[%s1748_s5] sm:$0xff]  ;;  %v943_v29 = vld [vmem:[%s1749_s6 + $0x10] sm:$0xff]  ;;  %v942_v30 = vld [vmem:[%s1749_s6 + $0x8] sm:$0xff] }
  0x1d   : > { %1317 = vmatprep.mubr.msk.f32.mxu0 %vm454_vm1, %v1578_v12  ;;  %1330 = vmatpush3.msra.mxu1 %v565_v11  ;;  %v941_v31 = vld [vmem:[%s1749_s6] sm:$0xff]  ;;  %v447_v40 = vld [vmem:[%s1524_s23 + $0x8] sm:$0xff]  ;;  %v449_v47 = vld [vmem:[%s1524_s23 + $0x18] sm:$0xff] }
  0x1e   : > { %1331 = vmatprep.mubr.msk.f32.mxu1 %vm454_vm1, %v1578_v12  ;;  %1318 = vmatmul.mubr.msk.f32.vlgmr.msra.gmra.mxu0 %vm454_vm1, %v1580_v13  ;;  %v446_v46 = vld [vmem:[%s1524_s23] sm:$0xff]  ;;  %v448_v56 = vld [vmem:[%s1524_s23 + $0x10] sm:$0xff]  ;;  %v562_v1 = vld [vmem:[%s1529_s26 + $0x8] sm:$0xff] }
  0x1f   : > { %1332 = vmatmul.mubr.msk.f32.vlgmr.msra.gmra.mxu1 %vm454_vm1, %v1580_v13  ;;  %1337 = vmatprep.subr.mxu0 %v669_v14  ;;  %v561_v7 = vld [vmem:[%s1529_s26] sm:$0xff] }
  0x20   : > { %1351 = vmatprep.subr.mxu1 %v766_v15  ;;  %1338 = vmatpush3.msra.mxu0 %v669_v14  ;;  %v564_v14 = vld [vmem:[%s1529_s26 + $0x18] sm:$0xff] }
  0x21   : > { %1352 = vmatpush3.msra.mxu1 %v766_v15  ;;  %1339 = vmatprep.subr.mxu0 %v668_v16 }
  0x22   : > { %1353 = vmatprep.subr.mxu1 %v765_v17  ;;  %1320 = vmatprep.mubr.msk.f32.mxu0 %vm454_vm1, %v1602_v18 }
  0x23   : > { %1334 = vmatprep.mubr.msk.f32.mxu1 %vm454_vm1, %v1602_v18  ;;  %1340 = vmatpush3.msra.mxu0 %v668_v16 }
  0x24   : > { %1354 = vmatpush3.msra.mxu1 %v765_v17  ;;  %1321 = vmatmul.mubr.msk.f32.gmra.mxu0 %vm454_vm1, %v1604_v19 }
  0x25   : > { %1335 = vmatmul.mubr.msk.f32.gmra.mxu1 %vm454_vm1, %v1604_v19  ;;  %1341 = vmatprep.subr.mxu0 %v667_v20 }
  0x26   : > { %1355 = vmatprep.subr.mxu1 %v764_v21  ;;  %1342 = vmatpush3.msra.mxu0 %v667_v20 }
  0x27   : > { %1356 = vmatpush3.msra.mxu1 %v764_v21  ;;  %1343 = vmatprep.subr.mxu0 %v666_v22  ;;  %v563_v21 = vld [vmem:[%s1529_s26 + $0x10] sm:$0xff] }
  0x28   : > { %1357 = vmatprep.subr.mxu1 %v763_v23  ;;  %1344 = vmatpush3.msra.mxu0 %v666_v22 }
  0x29   : > { %1345 = vmatprep.mubr.msk.f32.mxu0 %vm454_vm1, %v1578_v12  ;;  %1358 = vmatpush3.msra.mxu1 %v763_v23 }
  0x2a   : > { %1359 = vmatprep.mubr.msk.f32.mxu1 %vm454_vm1, %v1578_v12  ;;  %1346 = vmatmul.mubr.msk.f32.vlgmr.msra.gmra.mxu0 %vm454_vm1, %v1580_v13 }
  0x2b   : > { %1360 = vmatmul.mubr.msk.f32.vlgmr.msra.gmra.mxu1 %vm454_vm1, %v1580_v13  ;;  %1365 = vmatprep.subr.mxu0 %v855_v24 }
  0x2c   : > { %1348 = vmatprep.mubr.msk.f32.mxu0 %vm454_vm1, %v1602_v18  ;;  %1366 = vmatpush3.msra.mxu0 %v855_v24 }
  0x2d   : > { %1362 = vmatprep.mubr.msk.f32.mxu1 %vm454_vm1, %v1602_v18  ;;  %1367 = vmatprep.subr.mxu0 %v854_v25 }
  0x2e   : > { %1379 = vmatprep.subr.mxu1 %v944_v26  ;;  %1368 = vmatpush3.msra.mxu0 %v854_v25 }
  0x2f   : > { %1363 = vmatmul.mubr.msk.f32.gmra.mxu1 %vm454_vm1, %v1604_v19  ;;  %1349 = vmatmul.mubr.msk.f32.gmra.mxu0 %vm454_vm1, %v1604_v19 }
  0x30   : > { %1369 = vmatprep.subr.mxu0 %v853_v27  ;;  %1373 = vmatprep.mubr.msk.f32.mxu0 %vm454_vm1, %v1578_v12 }
  0x31   : > { %1370 = vmatpush3.msra.mxu0 %v853_v27  ;;  %1380 = vmatpush3.msra.mxu1 %v944_v26 }
  0x32   : > { %1371 = vmatprep.subr.mxu0 %v852_v28  ;;  %1381 = vmatprep.subr.mxu1 %v943_v29 }
  0x33   : > { %1372 = vmatpush3.msra.mxu0 %v852_v28  ;;  %1382 = vmatpush3.msra.mxu1 %v943_v29 }
  0x34   : > { %1374 = vmatmul.mubr.msk.f32.vlgmr.msra.gmra.mxu0 %vm454_vm1, %v1580_v13  ;;  %1383 = vmatprep.subr.mxu1 %v942_v30 }
  0x35   : > { %1376 = vmatprep.mubr.msk.f32.mxu0 %vm454_vm1, %v1602_v18  ;;  %1384 = vmatpush3.msra.mxu1 %v942_v30 }
  0x36   : > { %1387 = vmatprep.mubr.msk.f32.mxu1 %vm454_vm1, %v1578_v12  ;;  %1385 = vmatprep.subr.mxu1 %v941_v31 }
  0x37   : > { %1386 = vmatpush3.msra.mxu1 %v941_v31 }
  0x38   : > { %1377 = vmatmul.mubr.msk.f32.gmra.mxu0 %vm454_vm1, %v1604_v19  ;;  %1388 = vmatmul.mubr.msk.f32.vlgmr.msra.gmra.mxu1 %vm454_vm1, %v1580_v13 }
  0x39   : > { %1390 = vmatprep.mubr.msk.f32.mxu1 %vm454_vm1, %v1602_v18 }
  0x3c   : > { %1391 = vmatmul.mubr.msk.f32.gmra.mxu1 %vm454_vm1, %v1604_v19 }
  0xde   : > { %v1319_v32 = vpop.f32.mrf.mxu0 }
  0xdf   : > { %v1333_v33 = vpop.f32.mrf.mxu1  ;;  %v554_v37 = vmul.f32 %v1319_v32, %v1683_v36 }
  0xe0   : > { %v533_v34 = vpop.f32.mrf.mxu0  ;;  %v655_v59 = vmul.f32 %v1333_v33, %v1683_v36 }
  0xe1   : > { %v635_v35 = vpop.f32.mrf.mxu1  ;;  %v553_v43 = vmul.f32 %v1683_v36, %v533_v34  ;;  %v558_v45 = vadd.f32 %v554_v37, %v447_v40 }
  0xe2   : > { %v654_v2 = vmul.f32 %v635_v35, %v1683_v36  ;;  %v659_v9 = vadd.f32 %v655_v59, %v562_v1 }
  0xe3   : > { %v557_v52 = vadd.f32 %v553_v43, %v446_v46 }
  0xe4   : > { %v1322_v38 = vpop.f32.mrf.mxu0  ;;  %v658_v17 = vadd.f32 %v654_v2, %v561_v7 }
  0xe5   : > { %v1336_v39 = vpop.f32.mrf.mxu1  ;;  %v556_v44 = vmul.f32 %v1322_v38, %v1683_v36 }
  0xe6   : > { %v543_v41 = vpop.f32.mrf.mxu0  ;;  %v657_v8 = vmul.f32 %v1336_v39, %v1683_v36 }
  0xe7   : > { %v645_v42 = vpop.f32.mrf.mxu1  ;;  %v555_v50 = vmul.f32 %v1683_v36, %v543_v41  ;;  %v560_v53 = vadd.f32 %v556_v44, %v449_v47  ;;  %v1242_v44 = vld [vmem:[%s1750_s7] ss:$0 sm:$0xff] }
  0xe8   : > { %v656_v15 = vmul.f32 %v645_v42, %v1683_v36  ;;  %v661_v24 = vadd.f32 %v657_v8, %v564_v14 }
  0xe9   : > { %v559_v0 = vadd.f32 %v555_v50, %v448_v56  ;;  %v663_v50 = vld [vmem:[%s1534_s29 + $0x8] sm:$0xff] }
  0xea   : > { %v1691_v48 = vpop.f32.mrf.mxu0  ;;  %v660_v28 = vadd.f32 %v656_v15, %v563_v21 }
  0xeb   : > { %v1361_v49 = vpop.f32.mrf.mxu1  ;;  %v756_v47 = vmul.f32 %v1691_v48, %v1683_v36 }
  0xec   : > { %v1038_v51 = vadd.f32 %v1361_v49, %v558_v45  ;;  %v1694_v54 = vpop.f32.mrf.mxu0 }
  0xed   : > { %v833_v55 = vpop.f32.mrf.mxu1 }
  0xee   : > { %v1248_v57 = vmul.f32 -1.442695, %v1038_v51  ;;  %v1037_v58 = vadd.f32 %v833_v55, %v557_v52 }
  0xef   : > { %v1364_v60 = vpop.f32.mrf.mxu1  ;;  %v1698_v62 = vpop.f32.mrf.mxu0 }
  0xf0   : > { %1401 = vpow2.f32 %v1248_v57  ;;  %v1247_v61 = vmul.f32 -1.442695, %v1037_v58  ;;  %v1040_v63 = vadd.f32 %v1364_v60, %v560_v53  ;;  %v755_v53 = vmul.f32 %v1694_v54, %v1683_v36  ;;  %v662_v57 = vld [vmem:[%s1534_s29] sm:$0xff] }
  0xf1   : > { %v843_v3 = vpop.f32.mrf.mxu1  ;;  %v1702_v5 = vpop.f32.mrf.mxu0  ;;  %v760_v60 = vadd.f32 %v756_v47, %v663_v50 }
  0xf2   : > { %1403 = vpow2.f32 %v1247_v61  ;;  %v1250_v4 = vmul.f32 -1.442695, %v1040_v63  ;;  %v1039_v6 = vadd.f32 %v843_v3, %v559_v0  ;;  %v758_v61 = vmul.f32 %v1698_v62, %v1683_v36  ;;  %v665_v0 = vld [vmem:[%s1534_s29 + $0x18] sm:$0xff]  ;;  %v664_v62 = vld [vmem:[%s1534_s29 + $0x10] sm:$0xff] }
  0xf3   : > { %v757_v7 = vmul.f32 %v1702_v5, %v1683_v36 }
  0xf4   : > { %1405 = vpow2.f32 %v1250_v4  ;;  %v1249_v10 = vmul.f32 -1.442695, %v1039_v6  ;;  %v1375_v11 = vpop.f32.mrf.mxu0  ;;  %v759_v4 = vadd.f32 %v755_v53, %v662_v57 }
  0xf5   : > { %v1066_v16 = vadd.f32 %v1375_v11, %v659_v9  ;;  %v762_v11 = vadd.f32 %v758_v61, %v665_v0 }
  0xf6   : > { %1407 = vpow2.f32 %v1249_v10  ;;  %v922_v20 = vpop.f32.mrf.mxu0 }
  0xf7   : > { %v1252_v22 = vmul.f32 -1.442695, %v1066_v16  ;;  %v1065_v23 = vadd.f32 %v922_v20, %v658_v17  ;;  %v761_v20 = vadd.f32 %v757_v7, %v664_v62 }
  0xf8   : > { %v1378_v25 = vpop.f32.mrf.mxu0  ;;  %v1389_v41 = vpop.f32.mrf.mxu1 }
  0xf9   : > { %v1251_v26 = vmul.f32 -1.442695, %v1065_v23  ;;  %v1068_v27 = vadd.f32 %v1378_v25, %v661_v24  ;;  %1409 = vpow2.f32 %v1252_v22  ;;  %v1024_v52 = vadd.f32 %v1389_v41, %v1242_v44 }
  0xfa   : > { %v932_v29 = vpop.f32.mrf.mxu0  ;;  %v1018_v45 = vpop.f32.mrf.mxu1 }
  0xfb   : > { %v1254_v30 = vmul.f32 -1.442695, %v1068_v27  ;;  %v1067_v31 = vadd.f32 %v932_v29, %v660_v28  ;;  %1411 = vpow2.f32 %v1251_v26  ;;  %v1019_v1 = vadd.f32 %v1242_v44, %v1018_v45 }
  0xfc   : > { %v1392_v55 = vpop.f32.mrf.mxu1 }
  0xfd   : > { %v1402_v32 = vpop.eup %1401  ;;  %1413 = vpow2.f32 %v1254_v30  ;;  %v1253_v33 = vmul.f32 -1.442695, %v1067_v31  ;;  %v1034_v2 = vadd.f32 %v1392_v55, %v1242_v44 }
  0xfe   : > { %v1054_v34 = vadd.f32 1.0, %v1402_v32  ;;  %v1028_v54 = vpop.f32.mrf.mxu1 }
  0xff   : > { %v1404_v35 = vpop.eup %1403  ;;  %1415 = vpow2.f32 %v1253_v33  ;;  %v1029_v16 = vadd.f32 %v1242_v44, %v1028_v54 }
 0x100   : > { %1417 = vrcp.f32 %v1054_v34  ;;  %v1053_v37 = vadd.f32 1.0, %v1404_v35 }
 0x101   : > { %v1406_v38 = vpop.eup %1405 }
 0x102   : > { %1419 = vrcp.f32 %v1053_v37  ;;  %v1056_v39 = vadd.f32 1.0, %v1406_v38 }
 0x103   : > { %v1408_v40 = vpop.eup %1407 }
 0x104   : > { %1421 = vrcp.f32 %v1056_v39  ;;  %v1055_v42 = vadd.f32 1.0, %v1408_v40 }
 0x106   : > { %1423 = vrcp.f32 %v1055_v42  ;;  %v1410_v43 = vpop.eup %1409 }
 0x107   : > { %v1082_v51 = vadd.f32 1.0, %v1410_v43 }
 0x108   : > { %v1412_v46 = vpop.eup %1411 }
 0x109   : > { %v1081_v58 = vadd.f32 1.0, %v1412_v46  ;;  %1425 = vrcp.f32 %v1082_v51 }
 0x10a   : > { %v1414_v49 = vpop.eup %1413 }
 0x10b   : > { %v1084_v63 = vadd.f32 1.0, %v1414_v49  ;;  %1427 = vrcp.f32 %v1081_v58 }
 0x10c   : > { %v1416_v56 = vpop.eup %1415 }
 0x10d   : > { %v1418_v59 = vpop.eup %1417  ;;  %v1083_v6 = vadd.f32 1.0, %v1416_v56  ;;  %1429 = vrcp.f32 %v1084_v63 }
 0x10e   : > { %v1094_v48 = vmul.f32 %v1418_v59, %v1024_v52 }
 0x10f   : > { %v1420_v3 = vpop.eup %1419 }
 0x110   : > { %v1098_v8 = vadd.f32 %v1094_v48, %v760_v60  ;;  %v1093_v9 = vmul.f32 %v1420_v3, %v1019_v1 }
 0x111   : > { %v1422_v10 = vpop.eup %1421 }
 0x112   : > { %1431 = vtanh.f32 %v1098_v8  ;;  %v1097_v14 = vadd.f32 %v1093_v9, %v759_v4  ;;  %v1096_v15 = vmul.f32 %v1422_v10, %v1034_v2 }
 0x113   : > { %v1424_v17 = vpop.eup %1423  ;;  %1433 = vrcp.f32 %v1083_v6 }
 0x114   : > { %1435 = vtanh.f32 %v1097_v14  ;;  %v1100_v21 = vadd.f32 %v1096_v15, %v762_v11  ;;  %v1095_v22 = vmul.f32 %v1424_v17, %v1029_v16 }
 0x116   : > { %1437 = vtanh.f32 %v1100_v21  ;;  %v1099_v23 = vadd.f32 %v1095_v22, %v761_v20  ;;  %v1426_v36 = vpop.eup %1425 }
 0x117   : > { %v1106_v25 = vsub.f32 1.0, %v1426_v36  ;;  %v1114_v28 = vmul.f32 %v1426_v36, %v1580_v13 }
 0x118   : > { %1439 = vtanh.f32 %v1099_v23  ;;  %v1428_v5 = vpop.eup %1427 }
 0x119   : > { %v1105_v29 = vsub.f32 1.0, %v1428_v5  ;;  %v1113_v32 = vmul.f32 %v1428_v5, %v1578_v12 }
 0x11a   : > { %v1430_v24 = vpop.eup %1429 }
 0x11b   : > { %v1108_v33 = vsub.f32 1.0, %v1430_v24  ;;  %v1116_v38 = vmul.f32 %v1430_v24, %v1604_v19 }
 0x11f   : > { %v1432_v26 = vpop.eup %1431 }
 0x120   : > { %v1434_v27 = vpop.eup %1433  ;;  %v1110_v30 = vmul.f32 %v1432_v26, %v1106_v25 }
 0x121   : > { %v1436_v31 = vpop.eup %1435  ;;  %v1107_v39 = vsub.f32 1.0, %v1434_v27  ;;  %v1115_v42 = vmul.f32 %v1434_v27, %v1602_v18 }
 0x122   : > { %v1118_v34 = vadd.f32 %v1114_v28, %v1110_v30  ;;  %v1109_v35 = vmul.f32 %v1436_v31, %v1105_v29 }
 0x123   : > { %v1438_v37 = vpop.eup %1437 }
 0x124   : > { %1122 = vst.msk [vmem:[#allocation2 + $0x8] sm:$0xff] %vm454_vm1, %v1118_v34  ;;  %1126 = vst.msk [vmem:[%s1539_s13 + $0x8] sm:$0xff] %vm454_vm1, %v1118_v34  ;;  %v1117_v13 = vadd.f32 %v1113_v32, %v1109_v35  ;;  %v1112_v40 = vmul.f32 %v1438_v37, %v1108_v33 }
 0x125   : > { %v1440_v41 = vpop.eup %1439 }
 0x126   : > { %1121 = vst.msk [vmem:[#allocation2] sm:$0xff] %vm454_vm1, %v1117_v13  ;;  %1125 = vst.msk [vmem:[%s1539_s13] sm:$0xff] %vm454_vm1, %v1117_v13  ;;  %v1120_v12 = vadd.f32 %v1116_v38, %v1112_v40  ;;  %v1111_v43 = vmul.f32 %v1440_v41, %v1107_v39 }
 0x128   : > { %1124 = vst.msk [vmem:[#allocation2 + $0x18] sm:$0xff] %vm454_vm1, %v1120_v12  ;;  %1128 = vst.msk [vmem:[%s1539_s13 + $0x18] sm:$0xff] %vm454_vm1, %v1120_v12  ;;  %v1119_v19 = vadd.f32 %v1115_v42, %v1111_v43 }
 0x12a   : > { %1123 = vst.msk [vmem:[#allocation2 + $0x10] sm:$0xff] %vm454_vm1, %v1119_v19  ;;  %1127 = vst.msk [vmem:[%s1539_s13 + $0x10] sm:$0xff] %vm454_vm1, %v1119_v19 }
 0x12b PF: > { %s21_s17 = sadd.s32 1, %s1447_s17  }
 0x12c   : > { %p18_p6 = scmp.ge.s32.totalorder %s21_s17, 6  }
 0x12e   :  { %20 = sbr.rel (!%p18_p6) target bundleno = 1 (0x1), region = 104 }

</bundles_post_ra>
